<compile_context>
chip_gen: v7x
topology: tpu7x:2x2x1
jax: 0.10.0
libtpu: 0.0.40
codegen_flags: <defaults>
</compile_context>

<pallas_src>
import math
import numpy as np
import jax
import jax.numpy as jnp
from jax import lax
from jax.experimental import pallas as pl
from jax.experimental.pallas import tpu as pltpu


# ----------------------------- shared math helpers --------------------------------
def _gelu(x):
    # exact (erf-based) GELU, matching torch.nn.GELU default
    return 0.5 * x * (1.0 + lax.erf(x * (1.0 / math.sqrt(2.0))))


def _layernorm(x, g, b, eps=1e-5):
    mu = jnp.mean(x, axis=-1, keepdims=True)
    var = jnp.mean((x - mu) ** 2, axis=-1, keepdims=True)
    return (x - mu) * lax.rsqrt(var + eps) * g + b


def _sine_encoding_input(e, F):
    # eeig = [e | sin(100*e*div) | cos(100*e*div)]  -> (N, F+1).
    # Cheap host-side glue (already present in the PyTorch module); the kernel does
    # the single (N,F+1)x(F+1,F) matmul.
    e_col = e[:, None].astype(jnp.float32)
    div = jnp.exp(jnp.arange(0, F, 2, dtype=jnp.float32) * (-math.log(10000.0) / F))
    pe = (e_col * 100.0) * div[None, :]
    return jnp.concatenate([e_col, jnp.sin(pe), jnp.cos(pe)], axis=1)


# ----------------------------- packed-vector layout --------------------------------
def _vec_layout(F, hidden, signal, nclass, nlayer):
    """Row layout for the single (rows, width) f32 pack of all small vectors."""
    entries = [("eig_b", F), ("mha_g", F), ("mha_b", F),
               ("bq", F), ("bk", F), ("bv", F), ("bo", F),
               ("ffn_g", F), ("ffn_b", F), ("b1", F), ("b2", F),
               ("dec_w", F), ("dec_b", 1), ("feat_b", hidden), ("cls_b", nclass)]
    for l in range(nlayer):
        od = signal if l == nlayer - 1 else hidden
        entries += [(f"L{l}_b", od), (f"L{l}_g", od), (f"L{l}_beta", od)]
    layout = {name: (i, w) for i, (name, w) in enumerate(entries)}
    nrows = ((len(entries) + 7) // 8) * 8                       # sublane multiple
    width = ((max(w for _, w in entries) + 127) // 128) * 128   # lane multiple
    return layout, nrows, width


# ----------------------------- fused UniConv kernel --------------------------------
def make_uniconv_kernel(N, F, hidden, signal, nclass, nlayer, layout):
    scale = 1.0 / math.sqrt(F)   # single head => head_dim == F

    def kernel(eeig_ref, u_ref, x_ref, eig_w_ref, wstk_ref, feat_w_ref,
               lw_ref, cls_w_ref, vec_ref, o_ref):
        def vrow(name):
            r, w = layout[name]
            return vec_ref[r:r + 1, 0:w]      # static (1, w) slice at lane offset 0

        # ---- Filter(e): SineEncoding as ONE matmul on the pre-concatenated input --
        eig = (jnp.dot(eeig_ref[...], eig_w_ref[...],
                       preferred_element_type=jnp.float32) + vrow("eig_b"))

        # ---- MHA block (pre-LN + residual); Q/K/V from the stacked (6,F,F) weight -
        xn = _layernorm(eig, vrow("mha_g"), vrow("mha_b"))
        q = jnp.dot(xn, wstk_ref[0], preferred_element_type=jnp.float32) + vrow("bq")
        k = jnp.dot(xn, wstk_ref[1], preferred_element_type=jnp.float32) + vrow("bk")
        v = jnp.dot(xn, wstk_ref[2], preferred_element_type=jnp.float32) + vrow("bv")
        s = lax.dot_general(q, k, (((1,), (1,)), ((), ())),
                            preferred_element_type=jnp.float32) * scale
        s = s - jnp.max(s, axis=-1, keepdims=True)
        p = jnp.exp(s)
        p = p * pl.reciprocal(jnp.sum(p, axis=-1, keepdims=True), approx=True)
        attn = jnp.dot(p, v, preferred_element_type=jnp.float32)
        eig = eig + jnp.dot(attn, wstk_ref[3],
                            preferred_element_type=jnp.float32) + vrow("bo")

        # ---- FFN block (pre-LN + residual) ----------------------------------------
        xn = _layernorm(eig, vrow("ffn_g"), vrow("ffn_b"))
        hid = _gelu(jnp.dot(xn, wstk_ref[4],
                            preferred_element_type=jnp.float32) + vrow("b1"))
        eig = eig + jnp.dot(hid, wstk_ref[5],
                            preferred_element_type=jnp.float32) + vrow("b2")

        # ---- decoder Linear(F,1) as a lane reduce (no tiny (F,1) weight input) ----
        filt = jnp.sum(eig * vrow("dec_w"), axis=-1, keepdims=True) + vrow("dec_b")

        # ---- feat encoder ----------------------------------------------------------
        h = jnp.dot(x_ref[...], feat_w_ref[...],
                    preferred_element_type=jnp.float32) + vrow("feat_b")

        # ---- spectral conv layers: h, u, filt stay VMEM-resident across layers ----
        u_mat = u_ref[...]
        # broadcast hoisted out of the unrolled loop (JAX doesn't CSE broadcast_in_dim)
        filt_b = jnp.broadcast_to(filt, (N, hidden))
        for l in range(nlayer):
            out_dim = signal if l == nlayer - 1 else hidden
            # utx = u^T @ h via dim-0 contraction (MXU ingests LHS transposed).
            # TODO(synk): if pl.lower_as_mlir shows a materialized per-layer vxpose
            # of u, hoist ut = u_mat.T above the loop (irrelevant at N=16).
            utx = lax.dot_general(u_mat, h, (((0,), (0,)), ((), ())),
                                  preferred_element_type=jnp.float32)
            h = h + jnp.dot(u_mat, filt_b * utx, preferred_element_type=jnp.float32)
            # SpecLayer: Linear -> LayerNorm -> GELU (prop_dropout = identity)
            w_l = lw_ref[l][:, 0:out_dim]
            y = jnp.dot(h, w_l, preferred_element_type=jnp.float32) + vrow(f"L{l}_b")
            h = _gelu(_layernorm(y, vrow(f"L{l}_g"), vrow(f"L{l}_beta")))

        # ---- classifier ------------------------------------------------------------
        o_ref[...] = (jnp.dot(h, cls_w_ref[...],
                              preferred_element_type=jnp.float32) + vrow("cls_b"))

    return kernel


# ----------------------------- forward wrapper -------------------------------------
def uniconv_forward(e, u, x, packed):
    N = e.shape[0]
    F = packed["eig_w"].shape[1]
    hidden = packed["feat_w"].shape[1]
    signal, nclass = packed["cls_w"].shape
    nlayer = packed["layer_w"].shape[0]
    layout, _, _ = _vec_layout(F, hidden, signal, nclass, nlayer)

    eeig = _sine_encoding_input(e, F)

    kernel = make_uniconv_kernel(N=N, F=F, hidden=hidden, signal=signal,
                                 nclass=nclass, nlayer=nlayer, layout=layout)
    inputs = [eeig, u.astype(jnp.float32), x.astype(jnp.float32),
              packed["eig_w"], packed["wstack"], packed["feat_w"],
              packed["layer_w"], packed["cls_w"], packed["vec"]]
    return pl.pallas_call(
        kernel,
        out_shape=jax.ShapeDtypeStruct((N, nclass), jnp.float32),
        in_specs=[pl.BlockSpec(memory_space=pltpu.MemorySpace.VMEM)] * len(inputs),
        out_specs=pl.BlockSpec(memory_space=pltpu.MemorySpace.VMEM),
    )(*inputs)
    # TODO(synk): for batched multi-graph inference add a leading grid axis over
    # graphs with dimension_semantics=("parallel",...) so v7x's second TensorCore
    # is used and lanes/sublanes fill up; for large N, tile the spectral prop
    # (row tiles of u + resident h/filt) budgeted against v7x's 64 MiB VMEM.


# ----------------------------- parameters & packing --------------------------------
def init_params(key, nfeat, hidden_dim, signal_dim, filter_dim, nlayer, nclass):
    ks = iter(jax.random.split(key, 64))

    def w(shape, scale=0.1):
        return (scale * jax.random.normal(next(ks), shape)).astype(jnp.float32)

    F = filter_dim
    params = {
        "eig_w": w((F + 1, F)), "eig_b": w((F,)),
        "mha": {
            "ln_g": jnp.ones((F,), jnp.float32), "ln_b": jnp.zeros((F,), jnp.float32),
            "wq": w((F, F)), "wk": w((F, F)), "wv": w((F, F)),
            "bq": w((F,)), "bk": w((F,)), "bv": w((F,)),
            "wo": w((F, F)), "bo": w((F,)),
        },
        "ffn": {
            "ln_g": jnp.ones((F,), jnp.float32), "ln_b": jnp.zeros((F,), jnp.float32),
            "w1": w((F, F)), "b1": w((F,)),
            "w2": w((F, F)), "b2": w((F,)),
        },
        "dec_w": w((F, 1)), "dec_b": w((1,)),
        "feat_w": w((nfeat, hidden_dim)), "feat_b": w((hidden_dim,)),
        "cls_w": w((signal_dim, nclass)), "cls_b": w((nclass,)),
        "layers": [],
    }
    for i in range(nlayer):
        out_dim = signal_dim if i == nlayer - 1 else hidden_dim
        params["layers"].append({
            "w": w((hidden_dim, out_dim)), "b": w((out_dim,)),
            "g": jnp.ones((out_dim,), jnp.float32),
            "beta": jnp.zeros((out_dim,), jnp.float32),
        })
    return params


def pack_params(params, nlayer):
    """One-time host-side packing into the kernel's consolidated inputs."""
    F = params["eig_w"].shape[1]
    hidden = params["feat_w"].shape[1]
    signal, nclass = params["cls_w"].shape
    layout, nrows, width = _vec_layout(F, hidden, signal, nclass, nlayer)

    vec = np.zeros((nrows, width), np.float32)

    def put(name, arr):
        r, w = layout[name]
        vec[r, :w] = np.asarray(arr, np.float32).reshape(-1)

    m, f = params["mha"], params["ffn"]
    put("eig_b", params["eig_b"])
    put("mha_g", m["ln_g"]); put("mha_b", m["ln_b"])
    put("bq", m["bq"]); put("bk", m["bk"]); put("bv", m["bv"]); put("bo", m["bo"])
    put("ffn_g", f["ln_g"]); put("ffn_b", f["ln_b"])
    put("b1", f["b1"]); put("b2", f["b2"])
    put("dec_w", params["dec_w"]); put("dec_b", params["dec_b"])
    put("feat_b", params["feat_b"]); put("cls_b", params["cls_b"])

    out_max = max(hidden, signal)
    lw = np.zeros((nlayer, hidden, out_max), np.float32)
    for l, lp in enumerate(params["layers"]):
        od = lp["w"].shape[1]
        lw[l, :, :od] = np.asarray(lp["w"])
        put(f"L{l}_b", lp["b"]); put(f"L{l}_g", lp["g"]); put(f"L{l}_beta", lp["beta"])

    wstack = jnp.stack([m["wq"], m["wk"], m["wv"], m["wo"], f["w1"], f["w2"]], axis=0)

    return {
        "eig_w": jnp.asarray(params["eig_w"], jnp.float32),
        "wstack": wstack.astype(jnp.float32),
        "feat_w": jnp.asarray(params["feat_w"], jnp.float32),
        "layer_w": jnp.asarray(lw),
        "cls_w": jnp.asarray(params["cls_w"], jnp.float32),
        "vec": jnp.asarray(vec),
    }


# ----------------------------- pure-JAX reference ----------------------------------
def uniconv_reference(e, u, x, params):
    F = params["eig_w"].shape[1]
    eeig = _sine_encoding_input(e, F)
    eig = eeig @ params["eig_w"] + params["eig_b"]

    m = params["mha"]
    xn = _layernorm(eig, m["ln_g"], m["ln_b"])
    q = xn @ m["wq"] + m["bq"]
    k = xn @ m["wk"] + m["bk"]
    v = xn @ m["wv"] + m["bv"]
    s = (q @ k.T) / math.sqrt(F)
    p = jax.nn.softmax(s, axis=-1)
    eig = eig + (p @ v) @ m["wo"] + m["bo"]

    f = params["ffn"]
    xn = _layernorm(eig, f["ln_g"], f["ln_b"])
    eig = eig + _gelu(xn @ f["w1"] + f["b1"]) @ f["w2"] + f["b2"]

    filt = eig @ params["dec_w"] + params["dec_b"]
    h = x @ params["feat_w"] + params["feat_b"]
    ut = u.T
    for lp in params["layers"]:
        utx = ut @ h
        h = h + u @ (filt * utx)
        y = h @ lp["w"] + lp["b"]
        h = _gelu(_layernorm(y, lp["g"], lp["beta"]))
    return h @ params["cls_w"] + params["cls_b"]


# ----------------------------- main -------------------------------------------------
if __name__ == "__main__":
    N = 16            # number of nodes (= number of eigenvalues)
    nfeat = 8
    hidden_dim = 32
    signal_dim = 16
    filter_dim = 32
    nlayer = 2
    nclass = 1

    key = jax.random.PRNGKey(0)
    k_e, k_u, k_x, k_p = jax.random.split(key, 4)

    e = jax.random.uniform(k_e, (N,), dtype=jnp.float32) * 2.0            # eigenvalues
    u = jax.random.normal(k_u, (N, N), dtype=jnp.float32) / math.sqrt(N)  # eigenvectors
    x = jax.random.normal(k_x, (N, nfeat), dtype=jnp.float32)             # node features

    params = init_params(k_p, nfeat, hidden_dim, signal_dim, filter_dim, nlayer, nclass)
    packed = pack_params(params, nlayer)    # one-time packing (outside the jit)

    fwd = jax.jit(uniconv_forward)
    pred = jax.block_until_ready(fwd(e, u, x, packed))

    ref = jax.block_until_ready(uniconv_reference(e, u, x, params))
    assert pred.shape == (N, nclass) and pred.dtype == jnp.float32
    np.testing.assert_allclose(np.asarray(pred), np.asarray(ref), rtol=2e-2, atol=2e-2)
    print("KERNEL_OK")
</pallas_src>

<mosaic_0001>
module attributes {stable_mosaic.version = 11 : i64} {
  func.func @kernel(%arg0: memref<16x33xf32, #tpu.memory_space<vmem>>, %arg1: memref<16x16xf32, #tpu.memory_space<vmem>>, %arg2: memref<16x8xf32, #tpu.memory_space<vmem>>, %arg3: memref<33x32xf32, #tpu.memory_space<vmem>>, %arg4: memref<6x32x32xf32, #tpu.memory_space<vmem>>, %arg5: memref<8x32xf32, #tpu.memory_space<vmem>>, %arg6: memref<2x32x32xf32, #tpu.memory_space<vmem>>, %arg7: memref<16x1xf32, #tpu.memory_space<vmem>>, %arg8: memref<24x128xf32, #tpu.memory_space<vmem>>, %arg9: memref<16x1xf32, #tpu.memory_space<vmem>>) attributes {dimension_semantics = [], scalar_prefetch = 0 : i64, scratch_operands = 0 : i64, tpu.core_type = #tpu.core_type<tc>} {
    %c0 = arith.constant 0 : index
    %c0_0 = arith.constant 0 : index
    %0 = vector.load %arg0[%c0, %c0_0] : memref<16x33xf32, #tpu.memory_space<vmem>>, vector<16x33xf32>
    %c0_1 = arith.constant 0 : index
    %c0_2 = arith.constant 0 : index
    %1 = vector.load %arg3[%c0_1, %c0_2] : memref<33x32xf32, #tpu.memory_space<vmem>>, vector<33x32xf32>
    %cst = arith.constant dense<0.000000e+00> : vector<16x32xf32>
    %2 = tpu.matmul %0, %1, %cst {dimension_numbers = #tpu.dot_dimension_numbers<[1], [0], [0], [1], [0, 0, 1, 1], [], []>} : vector<16x33xf32>, vector<33x32xf32>, vector<16x32xf32> -> vector<16x32xf32>
    %c0_3 = arith.constant 0 : index
    %c0_4 = arith.constant 0 : index
    %3 = vector.load %arg8[%c0_3, %c0_4] : memref<24x128xf32, #tpu.memory_space<vmem>>, vector<1x32xf32>
    %4 = vector.broadcast %3 : vector<1x32xf32> to vector<16x32xf32>
    %5 = arith.addf %2, %4 : vector<16x32xf32>
    %c1 = arith.constant 1 : index
    %c0_5 = arith.constant 0 : index
    %6 = vector.load %arg8[%c1, %c0_5] : memref<24x128xf32, #tpu.memory_space<vmem>>, vector<1x32xf32>
    %c2 = arith.constant 2 : index
    %c0_6 = arith.constant 0 : index
    %7 = vector.load %arg8[%c2, %c0_6] : memref<24x128xf32, #tpu.memory_space<vmem>>, vector<1x32xf32>
    %cst_7 = arith.constant dense<0.000000e+00> : vector<16xf32>
    %8 = vector.multi_reduction <add>, %5, %cst_7 [1] : vector<16x32xf32> to vector<16xf32>
    %9 = vector.shape_cast %8 : vector<16xf32> to vector<16x1xf32>
    %cst_8 = arith.constant 3.200000e+01 : f32
    %10 = vector.broadcast %cst_8 : f32 to vector<16x1xf32>
    %11 = arith.divf %9, %10 : vector<16x1xf32>
    %12 = vector.broadcast %11 : vector<16x1xf32> to vector<16x32xf32>
    %13 = arith.subf %5, %12 : vector<16x32xf32>
    %14 = arith.mulf %13, %13 : vector<16x32xf32>
    %cst_9 = arith.constant dense<0.000000e+00> : vector<16xf32>
    %15 = vector.multi_reduction <add>, %14, %cst_9 [1] : vector<16x32xf32> to vector<16xf32>
    %16 = vector.shape_cast %15 : vector<16xf32> to vector<16x1xf32>
    %cst_10 = arith.constant 3.200000e+01 : f32
    %17 = vector.broadcast %cst_10 : f32 to vector<16x1xf32>
    %18 = arith.divf %16, %17 : vector<16x1xf32>
    %19 = vector.broadcast %11 : vector<16x1xf32> to vector<16x32xf32>
    %20 = arith.subf %5, %19 : vector<16x32xf32>
    %cst_11 = arith.constant 9.99999974E-6 : f32
    %21 = vector.broadcast %cst_11 : f32 to vector<16x1xf32>
    %22 = arith.addf %18, %21 : vector<16x1xf32>
    %23 = math.rsqrt %22 : vector<16x1xf32>
    %24 = vector.broadcast %23 : vector<16x1xf32> to vector<16x32xf32>
    %25 = arith.mulf %20, %24 : vector<16x32xf32>
    %26 = vector.broadcast %6 : vector<1x32xf32> to vector<16x32xf32>
    %27 = arith.mulf %25, %26 : vector<16x32xf32>
    %28 = vector.broadcast %7 : vector<1x32xf32> to vector<16x32xf32>
    %29 = arith.addf %27, %28 : vector<16x32xf32>
    %c0_12 = arith.constant 0 : index
    %c0_13 = arith.constant 0 : index
    %c0_14 = arith.constant 0 : index
    %30 = vector.load %arg4[%c0_12, %c0_13, %c0_14] : memref<6x32x32xf32, #tpu.memory_space<vmem>>, vector<1x32x32xf32>
    %31 = vector.shape_cast %30 : vector<1x32x32xf32> to vector<32x32xf32>
    %cst_15 = arith.constant dense<0.000000e+00> : vector<16x32xf32>
    %32 = tpu.matmul %29, %31, %cst_15 {dimension_numbers = #tpu.dot_dimension_numbers<[1], [0], [0], [1], [0, 0, 1, 1], [], []>} : vector<16x32xf32>, vector<32x32xf32>, vector<16x32xf32> -> vector<16x32xf32>
    %c3 = arith.constant 3 : index
    %c0_16 = arith.constant 0 : index
    %33 = vector.load %arg8[%c3, %c0_16] : memref<24x128xf32, #tpu.memory_space<vmem>>, vector<1x32xf32>
    %34 = vector.broadcast %33 : vector<1x32xf32> to vector<16x32xf32>
    %35 = arith.addf %32, %34 : vector<16x32xf32>
    %c1_17 = arith.constant 1 : index
    %c0_18 = arith.constant 0 : index
    %c0_19 = arith.constant 0 : index
    %36 = vector.load %arg4[%c1_17, %c0_18, %c0_19] : memref<6x32x32xf32, #tpu.memory_space<vmem>>, vector<1x32x32xf32>
    %37 = vector.shape_cast %36 : vector<1x32x32xf32> to vector<32x32xf32>
    %cst_20 = arith.constant dense<0.000000e+00> : vector<16x32xf32>
    %38 = tpu.matmul %29, %37, %cst_20 {dimension_numbers = #tpu.dot_dimension_numbers<[1], [0], [0], [1], [0, 0, 1, 1], [], []>} : vector<16x32xf32>, vector<32x32xf32>, vector<16x32xf32> -> vector<16x32xf32>
    %c4 = arith.constant 4 : index
    %c0_21 = arith.constant 0 : index
    %39 = vector.load %arg8[%c4, %c0_21] : memref<24x128xf32, #tpu.memory_space<vmem>>, vector<1x32xf32>
    %40 = vector.broadcast %39 : vector<1x32xf32> to vector<16x32xf32>
    %41 = arith.addf %38, %40 : vector<16x32xf32>
    %c2_22 = arith.constant 2 : index
    %c0_23 = arith.constant 0 : index
    %c0_24 = arith.constant 0 : index
    %42 = vector.load %arg4[%c2_22, %c0_23, %c0_24] : memref<6x32x32xf32, #tpu.memory_space<vmem>>, vector<1x32x32xf32>
    %43 = vector.shape_cast %42 : vector<1x32x32xf32> to vector<32x32xf32>
    %cst_25 = arith.constant dense<0.000000e+00> : vector<16x32xf32>
    %44 = tpu.matmul %29, %43, %cst_25 {dimension_numbers = #tpu.dot_dimension_numbers<[1], [0], [0], [1], [0, 0, 1, 1], [], []>} : vector<16x32xf32>, vector<32x32xf32>, vector<16x32xf32> -> vector<16x32xf32>
    %c5 = arith.constant 5 : index
    %c0_26 = arith.constant 0 : index
    %45 = vector.load %arg8[%c5, %c0_26] : memref<24x128xf32, #tpu.memory_space<vmem>>, vector<1x32xf32>
    %46 = vector.broadcast %45 : vector<1x32xf32> to vector<16x32xf32>
    %47 = arith.addf %44, %46 : vector<16x32xf32>
    %cst_27 = arith.constant dense<0.000000e+00> : vector<16x16xf32>
    %48 = tpu.matmul %35, %41, %cst_27 {dimension_numbers = #tpu.dot_dimension_numbers<[1], [1], [0], [0], [0, 0, 1, 0], [], []>} : vector<16x32xf32>, vector<16x32xf32>, vector<16x16xf32> -> vector<16x16xf32>
    %cst_28 = arith.constant 0.176776692 : f32
    %49 = vector.broadcast %cst_28 : f32 to vector<16x16xf32>
    %50 = arith.mulf %48, %49 : vector<16x16xf32>
    %cst_29 = arith.constant dense<0xFF800000> : vector<16xf32>
    %51 = vector.multi_reduction <maximumf>, %50, %cst_29 [1] : vector<16x16xf32> to vector<16xf32>
    %52 = vector.shape_cast %51 : vector<16xf32> to vector<16x1xf32>
    %53 = vector.broadcast %52 : vector<16x1xf32> to vector<16x16xf32>
    %54 = arith.subf %50, %53 : vector<16x16xf32>
    %55 = math.exp %54 : vector<16x16xf32>
    %cst_30 = arith.constant dense<0.000000e+00> : vector<16xf32>
    %56 = vector.multi_reduction <add>, %55, %cst_30 [1] : vector<16x16xf32> to vector<16xf32>
    %57 = vector.shape_cast %56 : vector<16xf32> to vector<16x1xf32>
    %58 = tpu.reciprocal %57 {approx = true} : vector<16x1xf32> -> vector<16x1xf32>
    %59 = vector.broadcast %58 : vector<16x1xf32> to vector<16x16xf32>
    %60 = arith.mulf %55, %59 : vector<16x16xf32>
    %cst_31 = arith.constant dense<0.000000e+00> : vector<16x32xf32>
    %61 = tpu.matmul %60, %47, %cst_31 {dimension_numbers = #tpu.dot_dimension_numbers<[1], [0], [0], [1], [0, 0, 1, 1], [], []>} : vector<16x16xf32>, vector<16x32xf32>, vector<16x32xf32> -> vector<16x32xf32>
    %c3_32 = arith.constant 3 : index
    %c0_33 = arith.constant 0 : index
    %c0_34 = arith.constant 0 : index
    %62 = vector.load %arg4[%c3_32, %c0_33, %c0_34] : memref<6x32x32xf32, #tpu.memory_space<vmem>>, vector<1x32x32xf32>
    %63 = vector.shape_cast %62 : vector<1x32x32xf32> to vector<32x32xf32>
    %cst_35 = arith.constant dense<0.000000e+00> : vector<16x32xf32>
    %64 = tpu.matmul %61, %63, %cst_35 {dimension_numbers = #tpu.dot_dimension_numbers<[1], [0], [0], [1], [0, 0, 1, 1], [], []>} : vector<16x32xf32>, vector<32x32xf32>, vector<16x32xf32> -> vector<16x32xf32>
    %65 = arith.addf %5, %64 : vector<16x32xf32>
    %c6 = arith.constant 6 : index
    %c0_36 = arith.constant 0 : index
    %66 = vector.load %arg8[%c6, %c0_36] : memref<24x128xf32, #tpu.memory_space<vmem>>, vector<1x32xf32>
    %67 = vector.broadcast %66 : vector<1x32xf32> to vector<16x32xf32>
    %68 = arith.addf %65, %67 : vector<16x32xf32>
    %c7 = arith.constant 7 : index
    %c0_37 = arith.constant 0 : index
    %69 = vector.load %arg8[%c7, %c0_37] : memref<24x128xf32, #tpu.memory_space<vmem>>, vector<1x32xf32>
    %c8 = arith.constant 8 : index
    %c0_38 = arith.constant 0 : index
    %70 = vector.load %arg8[%c8, %c0_38] : memref<24x128xf32, #tpu.memory_space<vmem>>, vector<1x32xf32>
    %cst_39 = arith.constant dense<0.000000e+00> : vector<16xf32>
    %71 = vector.multi_reduction <add>, %68, %cst_39 [1] : vector<16x32xf32> to vector<16xf32>
    %72 = vector.shape_cast %71 : vector<16xf32> to vector<16x1xf32>
    %cst_40 = arith.constant 3.200000e+01 : f32
    %73 = vector.broadcast %cst_40 : f32 to vector<16x1xf32>
    %74 = arith.divf %72, %73 : vector<16x1xf32>
    %75 = vector.broadcast %74 : vector<16x1xf32> to vector<16x32xf32>
    %76 = arith.subf %68, %75 : vector<16x32xf32>
    %77 = arith.mulf %76, %76 : vector<16x32xf32>
    %cst_41 = arith.constant dense<0.000000e+00> : vector<16xf32>
    %78 = vector.multi_reduction <add>, %77, %cst_41 [1] : vector<16x32xf32> to vector<16xf32>
    %79 = vector.shape_cast %78 : vector<16xf32> to vector<16x1xf32>
    %cst_42 = arith.constant 3.200000e+01 : f32
    %80 = vector.broadcast %cst_42 : f32 to vector<16x1xf32>
    %81 = arith.divf %79, %80 : vector<16x1xf32>
    %82 = vector.broadcast %74 : vector<16x1xf32> to vector<16x32xf32>
    %83 = arith.subf %68, %82 : vector<16x32xf32>
    %cst_43 = arith.constant 9.99999974E-6 : f32
    %84 = vector.broadcast %cst_43 : f32 to vector<16x1xf32>
    %85 = arith.addf %81, %84 : vector<16x1xf32>
    %86 = math.rsqrt %85 : vector<16x1xf32>
    %87 = vector.broadcast %86 : vector<16x1xf32> to vector<16x32xf32>
    %88 = arith.mulf %83, %87 : vector<16x32xf32>
    %89 = vector.broadcast %69 : vector<1x32xf32> to vector<16x32xf32>
    %90 = arith.mulf %88, %89 : vector<16x32xf32>
    %91 = vector.broadcast %70 : vector<1x32xf32> to vector<16x32xf32>
    %92 = arith.addf %90, %91 : vector<16x32xf32>
    %c4_44 = arith.constant 4 : index
    %c0_45 = arith.constant 0 : index
    %c0_46 = arith.constant 0 : index
    %93 = vector.load %arg4[%c4_44, %c0_45, %c0_46] : memref<6x32x32xf32, #tpu.memory_space<vmem>>, vector<1x32x32xf32>
    %94 = vector.shape_cast %93 : vector<1x32x32xf32> to vector<32x32xf32>
    %cst_47 = arith.constant dense<0.000000e+00> : vector<16x32xf32>
    %95 = tpu.matmul %92, %94, %cst_47 {dimension_numbers = #tpu.dot_dimension_numbers<[1], [0], [0], [1], [0, 0, 1, 1], [], []>} : vector<16x32xf32>, vector<32x32xf32>, vector<16x32xf32> -> vector<16x32xf32>
    %c9 = arith.constant 9 : index
    %c0_48 = arith.constant 0 : index
    %96 = vector.load %arg8[%c9, %c0_48] : memref<24x128xf32, #tpu.memory_space<vmem>>, vector<1x32xf32>
    %97 = vector.broadcast %96 : vector<1x32xf32> to vector<16x32xf32>
    %98 = arith.addf %95, %97 : vector<16x32xf32>
    %cst_49 = arith.constant 5.000000e-01 : f32
    %99 = vector.broadcast %cst_49 : f32 to vector<16x32xf32>
    %100 = arith.mulf %99, %98 : vector<16x32xf32>
    %cst_50 = arith.constant 0.707106769 : f32
    %101 = vector.broadcast %cst_50 : f32 to vector<16x32xf32>
    %102 = arith.mulf %98, %101 : vector<16x32xf32>
    %103 = math.erf %102 : vector<16x32xf32>
    %cst_51 = arith.constant 1.000000e+00 : f32
    %104 = vector.broadcast %cst_51 : f32 to vector<16x32xf32>
    %105 = arith.addf %104, %103 : vector<16x32xf32>
    %106 = arith.mulf %100, %105 : vector<16x32xf32>
    %c5_52 = arith.constant 5 : index
    %c0_53 = arith.constant 0 : index
    %c0_54 = arith.constant 0 : index
    %107 = vector.load %arg4[%c5_52, %c0_53, %c0_54] : memref<6x32x32xf32, #tpu.memory_space<vmem>>, vector<1x32x32xf32>
    %108 = vector.shape_cast %107 : vector<1x32x32xf32> to vector<32x32xf32>
    %cst_55 = arith.constant dense<0.000000e+00> : vector<16x32xf32>
    %109 = tpu.matmul %106, %108, %cst_55 {dimension_numbers = #tpu.dot_dimension_numbers<[1], [0], [0], [1], [0, 0, 1, 1], [], []>} : vector<16x32xf32>, vector<32x32xf32>, vector<16x32xf32> -> vector<16x32xf32>
    %110 = arith.addf %68, %109 : vector<16x32xf32>
    %c10 = arith.constant 10 : index
    %c0_56 = arith.constant 0 : index
    %111 = vector.load %arg8[%c10, %c0_56] : memref<24x128xf32, #tpu.memory_space<vmem>>, vector<1x32xf32>
    %112 = vector.broadcast %111 : vector<1x32xf32> to vector<16x32xf32>
    %113 = arith.addf %110, %112 : vector<16x32xf32>
    %c11 = arith.constant 11 : index
    %c0_57 = arith.constant 0 : index
    %114 = vector.load %arg8[%c11, %c0_57] : memref<24x128xf32, #tpu.memory_space<vmem>>, vector<1x32xf32>
    %115 = vector.broadcast %114 : vector<1x32xf32> to vector<16x32xf32>
    %116 = arith.mulf %113, %115 : vector<16x32xf32>
    %cst_58 = arith.constant dense<0.000000e+00> : vector<16xf32>
    %117 = vector.multi_reduction <add>, %116, %cst_58 [1] : vector<16x32xf32> to vector<16xf32>
    %118 = vector.shape_cast %117 : vector<16xf32> to vector<16x1xf32>
    %c12 = arith.constant 12 : index
    %c0_59 = arith.constant 0 : index
    %119 = vector.load %arg8[%c12, %c0_59] : memref<24x128xf32, #tpu.memory_space<vmem>>, vector<1x1xf32>
    %120 = vector.broadcast %119 : vector<1x1xf32> to vector<16x1xf32>
    %121 = arith.addf %118, %120 : vector<16x1xf32>
    %c0_60 = arith.constant 0 : index
    %c0_61 = arith.constant 0 : index
    %122 = vector.load %arg2[%c0_60, %c0_61] : memref<16x8xf32, #tpu.memory_space<vmem>>, vector<16x8xf32>
    %c0_62 = arith.constant 0 : index
    %c0_63 = arith.constant 0 : index
    %123 = vector.load %arg5[%c0_62, %c0_63] : memref<8x32xf32, #tpu.memory_space<vmem>>, vector<8x32xf32>
    %cst_64 = arith.constant dense<0.000000e+00> : vector<16x32xf32>
    %124 = tpu.matmul %122, %123, %cst_64 {dimension_numbers = #tpu.dot_dimension_numbers<[1], [0], [0], [1], [0, 0, 1, 1], [], []>} : vector<16x8xf32>, vector<8x32xf32>, vector<16x32xf32> -> vector<16x32xf32>
    %c13 = arith.constant 13 : index
    %c0_65 = arith.constant 0 : index
    %125 = vector.load %arg8[%c13, %c0_65] : memref<24x128xf32, #tpu.memory_space<vmem>>, vector<1x32xf32>
    %126 = vector.broadcast %125 : vector<1x32xf32> to vector<16x32xf32>
    %127 = arith.addf %124, %126 : vector<16x32xf32>
    %c0_66 = arith.constant 0 : index
    %c0_67 = arith.constant 0 : index
    %128 = vector.load %arg1[%c0_66, %c0_67] : memref<16x16xf32, #tpu.memory_space<vmem>>, vector<16x16xf32>
    %129 = vector.shape_cast %121 : vector<16x1xf32> to vector<16x1xf32>
    %130 = vector.broadcast %129 : vector<16x1xf32> to vector<16x32xf32>
    %cst_68 = arith.constant dense<0.000000e+00> : vector<16x32xf32>
    %131 = tpu.matmul %128, %127, %cst_68 {dimension_numbers = #tpu.dot_dimension_numbers<[0], [0], [1], [1], [0, 1, 1, 1], [], []>} : vector<16x16xf32>, vector<16x32xf32>, vector<16x32xf32> -> vector<16x32xf32>
    %132 = arith.mulf %130, %131 : vector<16x32xf32>
    %cst_69 = arith.constant dense<0.000000e+00> : vector<16x32xf32>
    %133 = tpu.matmul %128, %132, %cst_69 {dimension_numbers = #tpu.dot_dimension_numbers<[1], [0], [0], [1], [0, 0, 1, 1], [], []>} : vector<16x16xf32>, vector<16x32xf32>, vector<16x32xf32> -> vector<16x32xf32>
    %134 = arith.addf %127, %133 : vector<16x32xf32>
    %c0_70 = arith.constant 0 : index
    %c0_71 = arith.constant 0 : index
    %c0_72 = arith.constant 0 : index
    %135 = vector.load %arg6[%c0_70, %c0_71, %c0_72] : memref<2x32x32xf32, #tpu.memory_space<vmem>>, vector<1x32x32xf32>
    %136 = vector.shape_cast %135 : vector<1x32x32xf32> to vector<32x32xf32>
    %cst_73 = arith.constant dense<0.000000e+00> : vector<16x32xf32>
    %137 = tpu.matmul %134, %136, %cst_73 {dimension_numbers = #tpu.dot_dimension_numbers<[1], [0], [0], [1], [0, 0, 1, 1], [], []>} : vector<16x32xf32>, vector<32x32xf32>, vector<16x32xf32> -> vector<16x32xf32>
    %c15 = arith.constant 15 : index
    %c0_74 = arith.constant 0 : index
    %138 = vector.load %arg8[%c15, %c0_74] : memref<24x128xf32, #tpu.memory_space<vmem>>, vector<1x32xf32>
    %139 = vector.broadcast %138 : vector<1x32xf32> to vector<16x32xf32>
    %140 = arith.addf %137, %139 : vector<16x32xf32>
    %c16 = arith.constant 16 : index
    %c0_75 = arith.constant 0 : index
    %141 = vector.load %arg8[%c16, %c0_75] : memref<24x128xf32, #tpu.memory_space<vmem>>, vector<1x32xf32>
    %c17 = arith.constant 17 : index
    %c0_76 = arith.constant 0 : index
    %142 = vector.load %arg8[%c17, %c0_76] : memref<24x128xf32, #tpu.memory_space<vmem>>, vector<1x32xf32>
    %cst_77 = arith.constant dense<0.000000e+00> : vector<16xf32>
    %143 = vector.multi_reduction <add>, %140, %cst_77 [1] : vector<16x32xf32> to vector<16xf32>
    %144 = vector.shape_cast %143 : vector<16xf32> to vector<16x1xf32>
    %cst_78 = arith.constant 3.200000e+01 : f32
    %145 = vector.broadcast %cst_78 : f32 to vector<16x1xf32>
    %146 = arith.divf %144, %145 : vector<16x1xf32>
    %147 = vector.broadcast %146 : vector<16x1xf32> to vector<16x32xf32>
    %148 = arith.subf %140, %147 : vector<16x32xf32>
    %149 = arith.mulf %148, %148 : vector<16x32xf32>
    %cst_79 = arith.constant dense<0.000000e+00> : vector<16xf32>
    %150 = vector.multi_reduction <add>, %149, %cst_79 [1] : vector<16x32xf32> to vector<16xf32>
    %151 = vector.shape_cast %150 : vector<16xf32> to vector<16x1xf32>
    %cst_80 = arith.constant 3.200000e+01 : f32
    %152 = vector.broadcast %cst_80 : f32 to vector<16x1xf32>
    %153 = arith.divf %151, %152 : vector<16x1xf32>
    %154 = vector.broadcast %146 : vector<16x1xf32> to vector<16x32xf32>
    %155 = arith.subf %140, %154 : vector<16x32xf32>
    %cst_81 = arith.constant 9.99999974E-6 : f32
    %156 = vector.broadcast %cst_81 : f32 to vector<16x1xf32>
    %157 = arith.addf %153, %156 : vector<16x1xf32>
    %158 = math.rsqrt %157 : vector<16x1xf32>
    %159 = vector.broadcast %158 : vector<16x1xf32> to vector<16x32xf32>
    %160 = arith.mulf %155, %159 : vector<16x32xf32>
    %161 = vector.broadcast %141 : vector<1x32xf32> to vector<16x32xf32>
    %162 = arith.mulf %160, %161 : vector<16x32xf32>
    %163 = vector.broadcast %142 : vector<1x32xf32> to vector<16x32xf32>
    %164 = arith.addf %162, %163 : vector<16x32xf32>
    %cst_82 = arith.constant 5.000000e-01 : f32
    %165 = vector.broadcast %cst_82 : f32 to vector<16x32xf32>
    %166 = arith.mulf %165, %164 : vector<16x32xf32>
    %cst_83 = arith.constant 0.707106769 : f32
    %167 = vector.broadcast %cst_83 : f32 to vector<16x32xf32>
    %168 = arith.mulf %164, %167 : vector<16x32xf32>
    %169 = math.erf %168 : vector<16x32xf32>
    %cst_84 = arith.constant 1.000000e+00 : f32
    %170 = vector.broadcast %cst_84 : f32 to vector<16x32xf32>
    %171 = arith.addf %170, %169 : vector<16x32xf32>
    %172 = arith.mulf %166, %171 : vector<16x32xf32>
    %cst_85 = arith.constant dense<0.000000e+00> : vector<16x32xf32>
    %173 = tpu.matmul %128, %172, %cst_85 {dimension_numbers = #tpu.dot_dimension_numbers<[0], [0], [1], [1], [0, 1, 1, 1], [], []>} : vector<16x16xf32>, vector<16x32xf32>, vector<16x32xf32> -> vector<16x32xf32>
    %174 = arith.mulf %130, %173 : vector<16x32xf32>
    %cst_86 = arith.constant dense<0.000000e+00> : vector<16x32xf32>
    %175 = tpu.matmul %128, %174, %cst_86 {dimension_numbers = #tpu.dot_dimension_numbers<[1], [0], [0], [1], [0, 0, 1, 1], [], []>} : vector<16x16xf32>, vector<16x32xf32>, vector<16x32xf32> -> vector<16x32xf32>
    %176 = arith.addf %172, %175 : vector<16x32xf32>
    %c1_87 = arith.constant 1 : index
    %c0_88 = arith.constant 0 : index
    %c0_89 = arith.constant 0 : index
    %177 = vector.load %arg6[%c1_87, %c0_88, %c0_89] : memref<2x32x32xf32, #tpu.memory_space<vmem>>, vector<1x32x32xf32>
    %178 = vector.shape_cast %177 : vector<1x32x32xf32> to vector<32x32xf32>
    %179 = vector.extract_strided_slice %178 {offsets = [0, 0], sizes = [32, 16], strides = [1, 1]} : vector<32x32xf32> to vector<32x16xf32>
    %cst_90 = arith.constant dense<0.000000e+00> : vector<16x16xf32>
    %180 = tpu.matmul %176, %179, %cst_90 {dimension_numbers = #tpu.dot_dimension_numbers<[1], [0], [0], [1], [0, 0, 1, 1], [], []>} : vector<16x32xf32>, vector<32x16xf32>, vector<16x16xf32> -> vector<16x16xf32>
    %c18 = arith.constant 18 : index
    %c0_91 = arith.constant 0 : index
    %181 = vector.load %arg8[%c18, %c0_91] : memref<24x128xf32, #tpu.memory_space<vmem>>, vector<1x16xf32>
    %182 = vector.broadcast %181 : vector<1x16xf32> to vector<16x16xf32>
    %183 = arith.addf %180, %182 : vector<16x16xf32>
    %c19 = arith.constant 19 : index
    %c0_92 = arith.constant 0 : index
    %184 = vector.load %arg8[%c19, %c0_92] : memref<24x128xf32, #tpu.memory_space<vmem>>, vector<1x16xf32>
    %c20 = arith.constant 20 : index
    %c0_93 = arith.constant 0 : index
    %185 = vector.load %arg8[%c20, %c0_93] : memref<24x128xf32, #tpu.memory_space<vmem>>, vector<1x16xf32>
    %cst_94 = arith.constant dense<0.000000e+00> : vector<16xf32>
    %186 = vector.multi_reduction <add>, %183, %cst_94 [1] : vector<16x16xf32> to vector<16xf32>
    %187 = vector.shape_cast %186 : vector<16xf32> to vector<16x1xf32>
    %cst_95 = arith.constant 1.600000e+01 : f32
    %188 = vector.broadcast %cst_95 : f32 to vector<16x1xf32>
    %189 = arith.divf %187, %188 : vector<16x1xf32>
    %190 = vector.broadcast %189 : vector<16x1xf32> to vector<16x16xf32>
    %191 = arith.subf %183, %190 : vector<16x16xf32>
    %192 = arith.mulf %191, %191 : vector<16x16xf32>
    %cst_96 = arith.constant dense<0.000000e+00> : vector<16xf32>
    %193 = vector.multi_reduction <add>, %192, %cst_96 [1] : vector<16x16xf32> to vector<16xf32>
    %194 = vector.shape_cast %193 : vector<16xf32> to vector<16x1xf32>
    %cst_97 = arith.constant 1.600000e+01 : f32
    %195 = vector.broadcast %cst_97 : f32 to vector<16x1xf32>
    %196 = arith.divf %194, %195 : vector<16x1xf32>
    %197 = vector.broadcast %189 : vector<16x1xf32> to vector<16x16xf32>
    %198 = arith.subf %183, %197 : vector<16x16xf32>
    %cst_98 = arith.constant 9.99999974E-6 : f32
    %199 = vector.broadcast %cst_98 : f32 to vector<16x1xf32>
    %200 = arith.addf %196, %199 : vector<16x1xf32>
    %201 = math.rsqrt %200 : vector<16x1xf32>
    %202 = vector.broadcast %201 : vector<16x1xf32> to vector<16x16xf32>
    %203 = arith.mulf %198, %202 : vector<16x16xf32>
    %204 = vector.broadcast %184 : vector<1x16xf32> to vector<16x16xf32>
    %205 = arith.mulf %203, %204 : vector<16x16xf32>
    %206 = vector.broadcast %185 : vector<1x16xf32> to vector<16x16xf32>
    %207 = arith.addf %205, %206 : vector<16x16xf32>
    %cst_99 = arith.constant 5.000000e-01 : f32
    %208 = vector.broadcast %cst_99 : f32 to vector<16x16xf32>
    %209 = arith.mulf %208, %207 : vector<16x16xf32>
    %cst_100 = arith.constant 0.707106769 : f32
    %210 = vector.broadcast %cst_100 : f32 to vector<16x16xf32>
    %211 = arith.mulf %207, %210 : vector<16x16xf32>
    %212 = math.erf %211 : vector<16x16xf32>
    %cst_101 = arith.constant 1.000000e+00 : f32
    %213 = vector.broadcast %cst_101 : f32 to vector<16x16xf32>
    %214 = arith.addf %213, %212 : vector<16x16xf32>
    %215 = arith.mulf %209, %214 : vector<16x16xf32>
    %c0_102 = arith.constant 0 : index
    %c0_103 = arith.constant 0 : index
    %216 = vector.load %arg7[%c0_102, %c0_103] : memref<16x1xf32, #tpu.memory_space<vmem>>, vector<16x1xf32>
    %cst_104 = arith.constant dense<0.000000e+00> : vector<16x1xf32>
    %217 = tpu.matmul %215, %216, %cst_104 {dimension_numbers = #tpu.dot_dimension_numbers<[1], [0], [0], [1], [0, 0, 1, 1], [], []>} : vector<16x16xf32>, vector<16x1xf32>, vector<16x1xf32> -> vector<16x1xf32>
    %c14 = arith.constant 14 : index
    %c0_105 = arith.constant 0 : index
    %218 = vector.load %arg8[%c14, %c0_105] : memref<24x128xf32, #tpu.memory_space<vmem>>, vector<1x1xf32>
    %219 = vector.broadcast %218 : vector<1x1xf32> to vector<16x1xf32>
    %220 = arith.addf %217, %219 : vector<16x1xf32>
    %c0_106 = arith.constant 0 : index
    %c0_107 = arith.constant 0 : index
    %221 = vector.load %arg9[%c0_106, %c0_107] : memref<16x1xf32, #tpu.memory_space<vmem>>, vector<16x1xf32>
    tpu.vector_store %arg9[%c0_106, %c0_107], %220 {strides = array<i32>} : memref<16x1xf32, #tpu.memory_space<vmem>>, vector<16x1xf32>,
    return
  }
}

</mosaic_0001>

<bundles_post_ra>
// kernel: uniconv_forward.1
= control target key start
LH: loop header
LB: loop body
LE: loop exit
PB: predicated region body
PF: predicated region fallthrough
CT: control target
= control target key end

     0   :  { %14 = vsyncpa [#allocation3], 0  ;;  %s2677_s0 = inlined_call_operand.vmem [shape: f32[16,33], index: 0, kind: input, shape index: {}]   ;;  %s2678_s1 = inlined_call_operand.vmem [shape: f32[16,16], index: 1, kind: input, shape index: {}]   ;;  %s2679_s2 = inlined_call_operand.vmem [shape: f32[16,8], index: 2, kind: input, shape index: {}]   ;;  %s2680_s3 = inlined_call_operand.vmem [shape: f32[33,32], index: 3, kind: input, shape index: {}]   ;;  %s2681_s4 = inlined_call_operand.vmem [shape: f32[6,32,32], index: 4, kind: input, shape index: {}]   ;;  %s2682_s5 = inlined_call_operand.hbm [shape: f32[8,32], index: 5, kind: input, shape index: {}]   ;;  %s2683_s6 = inlined_call_operand.vmem [shape: f32[2,32,32], index: 6, kind: input, shape index: {}]   ;;  %s2684_s7 = inlined_call_operand.vmem [shape: f32[16,1], index: 7, kind: input, shape index: {}]   ;;  %s2685_s8 = inlined_call_operand.hbm [shape: f32[24,128], index: 8, kind: input, shape index: {}]   ;;  %s2686_s9 = inlined_call_operand.vmem [shape: f32[16,1], index: 9, kind: output, shape index: {}]  }
   0x1   :  { %15 = vsyncpa [#allocation5], 0  ;;  %s2352_s30 = smov [#allocation2]   ;;  %s2353_s11 = smov [#allocation4]  }
   0x2   :  { %s32_s10 = sshll.u32 %s2352_s30, 4  ;;  %s45_s12 = sshll.u32 %s2353_s11, 4  ;;  %s33_s10 = int_to_ptr.vmem [resolvable:$true] %s32_s10  ;;  %s2407_s12 = int_to_ptr.vmem [resolvable:$true] %s45_s12 }
   0x3   :  { %s2304_s15 = scalar_lea.hbm %s2682_s5, 128 }
   0x4   :  { %p2305_p0 = scmp.ne.s32.totalorder %s2682_s5, %s2304_s15  ;;  %p2308_p1 = scmp.lt.u32.totalorder %s2304_s15, %s2682_s5 }
   0x6   :  { %p2310_p2 = pnand %p2308_p1, %p2305_p0 }
   0x8   :  { %2313 = shalt.err (!%p2310_p2)
}
   0x9   :  { %s2314_s20 = scalar_lea.vmem %s33_s10, 128  ;;  %p2319_p4 = scmp.lt.s32.totalorder %s33_s10, %s33_s10 }
   0xa   :  { %p2315_p3 = scmp.ne.s32.totalorder %s33_s10, %s2314_s20  ;;  %p2320_p5 = scmp.lt.s32.totalorder %s2314_s20, %s2314_s20 }
   0xc   :  { %p2321_p6 = por %p2320_p5, %p2319_p4 }
   0xe   :  { %p2322_p7 = pnand %p2321_p6, %p2315_p3 }
  0x10   :  { %2325 = shalt.err (!%p2322_p7)
}
  0x11   :  { %35 = dma.hbm_to_vmem [thread:$0]  %s2682_s5, 128, %s33_s10, [#allocation3]  }
  0x12   :  { %s2326_s25 = scalar_lea.hbm %s2685_s8, 384 }
  0x13   :  { %p2327_p8 = scmp.ne.s32.totalorder %s2685_s8, %s2326_s25  ;;  %p2330_p9 = scmp.lt.u32.totalorder %s2326_s25, %s2685_s8 }
  0x15   :  { %p2332_p10 = pnand %p2330_p9, %p2327_p8 }
  0x17   :  { %2335 = shalt.err (!%p2332_p10)
}
  0x18   :  { %s2336_s30 = scalar_lea.vmem %s2407_s12, 384  ;;  %p2341_p12 = scmp.lt.s32.totalorder %s2407_s12, %s2407_s12 }
  0x19   :  { %p2337_p11 = scmp.ne.s32.totalorder %s2407_s12, %s2336_s30  ;;  %p2342_p13 = scmp.lt.s32.totalorder %s2336_s30, %s2336_s30 }
  0x1b   :  { %p2343_p0 = por %p2342_p13, %p2341_p12 }
  0x1d   :  { %p2344_p1 = pnand %p2343_p0, %p2337_p11 }
  0x1f   :  { %2347 = shalt.err (!%p2344_p1)
}
  0x20   :  { %s2354_s5 = smov 128   ;;  %s2355_s10 = smov 8  }
  0x21   :  { %51 = dma.hbm_to_vmem [thread:$0]  %s2685_s8, 384, %s2407_s12, [#allocation5], %s2354_s5, %s2354_s5, %s2355_s10  }
  0x22   :  { %2348 = dma.done.wait [#allocation3], 128  }
  0x23   :  { %2349 = vsyncadd [#allocation3], 4294967168 }
  0x24   :  { %2350 = dma.done.wait [#allocation5], 384  }
  0x25   :  { %2351 = vsyncadd [#allocation5], 4294966912  ;;  %vm70_vm0 = vcmask 269312   ;;  %v60_v0 = vld [vmem:[%s2680_s3] sm:$0xff]  ;;  %v61_v1 = vld [vmem:[%s2680_s3 + $0x8] sm:$0xff]  ;;  %vm77_vm1 = vcmask 1040384  }
  0x26   :  { %v62_v2 = vld [vmem:[%s2680_s3 + $0x10] sm:$0xff]  ;;  %v2158_v3 = vpack.c.bf16 %v61_v1, %v60_v0  ;;  %v63_v4 = vld [vmem:[%s2680_s3 + $0x18] sm:$0xff]  ;;  %v58_v5 = vld [vmem:[%s2677_s0] sm:$0xff]  ;;  %vm158_vm2 = vcmask 261120   ;;  %vm547_vm4 = vcmask 130048   ;;  %vm1010_vm5 = vcmask 64512  }
  0x27   :  { %v2162_v6 = vpack.c.bf16 %v63_v4, %v62_v2  ;;  %2013 = vmatprep.mubr.msk.f32.mxu0 %vm70_vm0, %v58_v5  ;;  %v64_v7 = vld [vmem:[%s2680_s3 + $0x20] sm:$0x1]  ;;  %v59_v8 = vld [vmem:[%s2677_s0 + $0x8] sm:$0xff]  ;;  %v200_v31 = vld [vmem:[%s2681_s4 + $0x10] sm:$0xff]  ;;  %vm1826_vm6 = vcmask 7168  }
  0x28   :  { %2159 = vmatprep.subr.bf16.mxu0 %v2158_v3  ;;  %v1835_v9 = vld [vmem:[#allocation4] ss:$0 sm:$0xff]  ;;  %v198_v26 = vld [vmem:[%s2681_s4] sm:$0xff]  ;;  %v201_v32 = vld [vmem:[%s2681_s4 + $0x18] sm:$0xff] }
  0x29   :  { %2161 = vmatpush3.bf16.msra.mxu0 %v2158_v3  ;;  %v199_v27 = vld [vmem:[%s2681_s4 + $0x8] sm:$0xff]  ;;  %v1851_v28 = vld [vmem:[%s2681_s4 + $0x40] sm:$0xff]  ;;  %v2170_v34 = vpack.c.bf16 %v201_v32, %v200_v31  ;;  %v1853_v35 = vld [vmem:[%s2681_s4 + $0x50] sm:$0xff] }
  0x2a   :  { %2163 = vmatprep.subr.bf16.mxu0 %v2162_v6  ;;  %v2166_v29 = vpack.c.bf16 %v199_v27, %v198_v26  ;;  %v1852_v30 = vld [vmem:[%s2681_s4 + $0x48] sm:$0xff]  ;;  %v1854_v36 = vld [vmem:[%s2681_s4 + $0x58] sm:$0xff]  ;;  %v1844_v38 = vld [vmem:[%s2681_s4 + $0x20] sm:$0xff] }
  0x2b   :  { %v2182_v33 = vpack.c.bf16 %v1852_v30, %v1851_v28  ;;  %v2186_v37 = vpack.c.bf16 %v1854_v36, %v1853_v35  ;;  %v1845_v39 = vld [vmem:[%s2681_s4 + $0x28] sm:$0xff]  ;;  %v1846_v55 = vld [vmem:[%s2681_s4 + $0x30] sm:$0xff]  ;;  %v1847_v56 = vld [vmem:[%s2681_s4 + $0x38] sm:$0xff] }
  0x2c   :  { %2167 = vmatprep.subr.bf16.mxu1 %v2166_v29  ;;  %v2174_v40 = vpack.c.bf16 %v1845_v39, %v1844_v38  ;;  %v1839_v48 = vld [vmem:[#allocation4 + $0x1] ss:$0 sm:$0xff]  ;;  %v1840_v50 = vld [vmem:[#allocation4 + $0x2] ss:$0 sm:$0xff]  ;;  %v2178_v59 = vpack.c.bf16 %v1847_v56, %v1846_v55  ;;  %v1855_v60 = vld [vmem:[#allocation4 + $0x5] ss:$0 sm:$0xff] }
  0x2d   :  { %2165 = vmatpush3.bf16.msra.mxu0 %v2162_v6  ;;  %2169 = vmatpush3.bf16.msra.mxu1 %v2166_v29  ;;  %v1841_v61 = vld [vmem:[#allocation4 + $0x3] ss:$0 sm:$0xff]  ;;  %v1848_v6 = vld [vmem:[#allocation4 + $0x4] ss:$0 sm:$0xff]  ;;  %vm2191_vm3 = vmpackc.low %vm158_vm2, %vm158_vm2 }
  0x2e   :  { %2011 = vmatprep.subr.msk.mxu0 %vm77_vm1, %v64_v7  ;;  %2171 = vmatprep.subr.bf16.mxu1 %v2170_v34  ;;  %v1864_v31 = vld [vmem:[%s2681_s4 + $0x60] sm:$0xff]  ;;  %v1865_v32 = vld [vmem:[%s2681_s4 + $0x68] sm:$0xff]  ;;  %v1867_v38 = vld [vmem:[%s2681_s4 + $0x78] sm:$0xff] }
  0x31   :  { %2012 = vmatpush3.msk.msra.mxu0 %vm77_vm1, %v64_v7  ;;  %2173 = vmatpush3.bf16.msra.mxu1 %v2170_v34 }
  0x32   :  { %2014 = vmatmul.mubr.msk.f32.vlgmr.msra.gmra.mrb[0].mxu0 %vm70_vm0, %v59_v8  ;;  %2183 = vmatprep.subr.bf16.mxu0 %v2182_v33 }
  0x33   :  { %2185 = vmatpush3.bf16.msra.mxu0 %v2182_v33  ;;  %2175 = vmatprep.subr.bf16.mxu1 %v2174_v40  ;;  %v2200_v33 = vpack.c.bf16 %v1865_v32, %v1864_v31  ;;  %v2588_v31 = vld [vmem:[%s2678_s1] sm:$0xff]  ;;  %v2594_v32 = vld [vmem:[%s2678_s1 + $0x8] sm:$0xff] }
  0x34   :  { %2187 = vmatprep.subr.bf16.mxu0 %v2186_v37 }
  0x37   :  { %2189 = vmatpush3.bf16.msra.mxu0 %v2186_v37  ;;  %v1866_v37 = vld [vmem:[%s2681_s4 + $0x70] sm:$0xff] }
 0x105   :  { %v2015_v10 = vpop.f32.mrb[0].mxu0 }
 0x106   :  { %v147_v11 = vpop.f32.mrb[1].mxu0  ;;  %v2463_v13 = vadd.f32 %v2015_v10, %v1835_v9 }
 0x107   :  { %v2461_v12 = vadd.f32 %v1835_v9, %v147_v11 }
 0x108   :  { %v162_v15 = vsel %vm158_vm2, %v2463_v13, 0.0 }
 0x109   :  { %v159_v14 = vsel %vm158_vm2, %v2461_v12, 0.0 }
 0x10a   :  { %160 = vadd.xlane.f32.xlu0 %v159_v14 }
 0x10e   :  { %163 = vadd.xlane.f32.xlu0 %v162_v15 }
 0x197   :  { %v161_v16 = vpop.xlane.xlu0 %160 }
 0x198   :  { %v166_v17 = vmul.f32 0.03125, %v161_v16 }
 0x19a   :  { %v168_v18 = vsub.f32 %v2461_v12, %v166_v17 }
 0x19b   :  { %v164_v19 = vpop.xlane.xlu0 %163 }
 0x19c   :  { %v167_v20 = vmul.f32 0.03125, %v164_v19  ;;  %v170_v21 = vmul.f32 %v168_v18, %v168_v18 }
 0x19e   :  { %v169_v22 = vsub.f32 %v2463_v13, %v167_v20  ;;  %v172_v23 = vsel %vm158_vm2, %v170_v21, 0.0 }
 0x19f   :  { %173 = vadd.xlane.f32.xlu1 %v172_v23 }
 0x1a0   :  { %v171_v24 = vmul.f32 %v169_v22, %v169_v22 }
 0x1a2   :  { %v175_v25 = vsel %vm158_vm2, %v171_v24, 0.0 }
 0x1a3   :  { %176 = vadd.xlane.f32.xlu1 %v175_v25 }
 0x22c   :  { %v174_v41 = vpop.xlane.xlu1 %173 }
 0x22d   :  { %v178_v42 = vmul.f32 0.03125, %v174_v41 }
 0x22f   :  { %v180_v43 = vadd.f32 1e-05, %v178_v42  ;;  %v2204_v42 = vpack.c.bf16 %v1867_v38, %v1866_v37 }
 0x230   :  { %v177_v44 = vpop.xlane.xlu1 %176 }
 0x231   :  { %2268 = vrsqrt.f32 %v180_v43  ;;  %v179_v45 = vmul.f32 0.03125, %v177_v44 }
 0x233   :  { %v181_v46 = vadd.f32 1e-05, %v179_v45 }
 0x235   :  { %2270 = vrsqrt.f32 %v181_v46  ;;  %v1870_v46 = vld [vmem:[#allocation4 + $0x6] ss:$0 sm:$0xff] }
 0x23b   :  { %v2269_v47 = vpop.eup %2268 }
 0x23c   :  { %v184_v49 = vmul.f32 %v2269_v47, %v168_v18 }
 0x23e   :  { %v190_v51 = vmul.f32 %v1839_v48, %v184_v49 }
 0x23f   :  { %v2271_v52 = vpop.eup %2270 }
 0x240   :  { %v185_v53 = vmul.f32 %v2271_v52, %v169_v22  ;;  %v196_v54 = vadd.f32 %v1840_v50, %v190_v51 }
 0x242   :  { %v191_v57 = vmul.f32 %v1839_v48, %v185_v53  ;;  %2024 = vmatprep.mubr.msk.f32.mxu1 %vm158_vm2, %v196_v54  ;;  %2046 = vmatprep.mubr.msk.f32.mxu0 %vm158_vm2, %v196_v54 }
 0x244   :  { %v197_v58 = vadd.f32 %v1840_v50, %v191_v57 }
 0x246   :  { %2025 = vmatmul.mubr.msk.f32.vlgmr.msra.gmra.mrb[0].mxu1 %vm158_vm2, %v197_v58  ;;  %2047 = vmatmul.mubr.msk.f32.vlgmr.msra.gmra.mrb[2].mxu0 %vm158_vm2, %v197_v58 }
 0x247   :  { %2177 = vmatpush3.bf16.msra.mxu1 %v2174_v40  ;;  %2035 = vmatprep.mubr.msk.f32.mxu1 %vm158_vm2, %v196_v54 }
 0x248   :  { %2179 = vmatprep.subr.bf16.mxu1 %v2178_v59 }
 0x24b   :  { %2181 = vmatpush3.bf16.msra.mxu1 %v2178_v59 }
 0x24e   :  { %2036 = vmatmul.mubr.msk.f32.vlgmr.msra.gmra.mrb[2].mxu1 %vm158_vm2, %v197_v58 }
 0x319   :  { %v2026_v62 = vpop.f32.mrb[0].mxu1  ;;  %v2048_v63 = vpop.f32.mrb[2].mxu0 }
 0x31a   :  { %v455_v0 = vadd.f32 %v2048_v63, %v1855_v60  ;;  %v279_v1 = vpop.f32.mrb[1].mxu1  ;;  %v449_v2 = vpop.f32.mrb[3].mxu0  ;;  %v285_v14 = vadd.f32 %v2026_v62, %v1841_v61  ;;  %v1873_v62 = vld [vmem:[%s2681_s4 + $0x80] sm:$0xff]  ;;  %v1874_v63 = vld [vmem:[%s2681_s4 + $0x88] sm:$0xff] }
 0x31b   :  { %v280_v3 = vadd.f32 %v1841_v61, %v279_v1  ;;  %v450_v4 = vadd.f32 %v1855_v60, %v449_v2  ;;  %v1875_v1 = vld [vmem:[%s2681_s4 + $0x90] sm:$0xff]  ;;  %v1876_v2 = vld [vmem:[%s2681_s4 + $0x98] sm:$0xff] }
 0x31d   :  { %v2196_v5 = vpack.c.bf16 %v455_v0, %v450_v4  ;;  %2053 = vmatprep.mubr.msk.f32.mxu1 %vm158_vm2, %v280_v3  ;;  %v2208_v0 = vpack.c.bf16 %v1874_v63, %v1873_v62  ;;  %v2212_v3 = vpack.c.bf16 %v1876_v2, %v1875_v1 }
 0x31f   :  { %2197 = vmatprep.subr.bf16.mxu0 %v2196_v5 }
 0x320   :  { %2199 = vmatpush3.bf16.msra.mxu0 %v2196_v5 }
 0x321   :  { %v2037_v7 = vpop.f32.mrb[2].mxu1  ;;  %2201 = vmatprep.subr.bf16.mxu0 %v2200_v33 }
 0x322   :  { %v370_v8 = vadd.f32 %v2037_v7, %v1848_v6  ;;  %v364_v9 = vpop.f32.mrb[3].mxu1 }
 0x323   :  { %v365_v10 = vadd.f32 %v1848_v6, %v364_v9 }
 0x325   :  { %v2190_v11 = vpack.c.bf16 %v370_v8, %v365_v10 }
 0x327   :  { %2192 = vmatprep.subr.msk.bf16.mxu1 %vm2191_vm3, %v2190_v11 }
 0x328   :  { %2195 = vmatpush3.bf16.xpose.msk.msra.mxu1 %vm2191_vm3, %v2190_v11  ;;  %v1871_v11 = vld [vmem:[#allocation4 + $0x7] ss:$0 sm:$0xff] }
 0x329   :  { %2209 = vmatprep.subr.bf16.mxu1 %v2208_v0 }
 0x32f   :  { %2054 = vmatmul.mubr.msk.f32.vlgmr.msra.gmra.mrb[4].mxu1 %vm158_vm2, %v285_v14 }
 0x330   :  { %2211 = vmatpush3.bf16.msra.mxu1 %v2208_v0 }
 0x331   :  { %2213 = vmatprep.subr.bf16.mxu1 %v2212_v3 }
 0x334   :  { %2215 = vmatpush3.bf16.msra.mxu1 %v2212_v3 }
 0x402   :  { %v2055_v15 = vpop.f32.mrb[4].mxu1 }
 0x403   :  { %v546_v16 = vmul.f32 0.17677669, %v2055_v15  ;;  %v536_v17 = vpop.f32.mrb[5].mxu1 }
 0x404   :  { %v545_v18 = vmul.f32 0.17677669, %v536_v17  ;;  %v1872_v17 = vld [vmem:[#allocation4 + $0x8] ss:$0 sm:$0xff] }
 0x405   :  { %v551_v19 = vsel %vm547_vm4, %v546_v16, -inf }
 0x406   :  { %552 = vmax.xlane.f32.xlu1 %v551_v19  ;;  %v548_v20 = vsel %vm547_vm4, %v545_v18, -inf }
 0x407   :  { %549 = vmax.xlane.f32.xlu0 %v548_v20 }
 0x493   :  { %v553_v21 = vpop.xlane.xlu1 %552 }
 0x494   :  { %v555_v22 = vsub.f32 %v546_v16, %v553_v21  ;;  %v550_v23 = vpop.xlane.xlu0 %549 }
 0x495   :  { %v554_v24 = vsub.f32 %v545_v18, %v550_v23  ;;  %v1881_v23 = vld [vmem:[%s2681_s4 + $0xa8] sm:$0xff] }
 0x496   :  { %v558_v25 = vmul.f32 1.442695, %v555_v22  ;;  %v1880_v22 = vld [vmem:[%s2681_s4 + $0xa0] sm:$0xff] }
 0x497   :  { %v556_v26 = vmul.f32 1.442695, %v554_v24  ;;  %v2216_v24 = vpack.c.bf16 %v1881_v23, %v1880_v22 }
 0x498   :  { %2272 = vpow2.f32 %v558_v25  ;;  %v1882_v25 = vld [vmem:[%s2681_s4 + $0xb0] sm:$0xff] }
 0x499   :  { %2274 = vpow2.f32 %v556_v26  ;;  %v1883_v26 = vld [vmem:[%s2681_s4 + $0xb8] sm:$0xff] }
 0x4a2   :  { %v2273_v27 = vpop.eup %2272 }
 0x4a3   :  { %v2275_v28 = vpop.eup %2274  ;;  %v563_v29 = vsel %vm547_vm4, %v2273_v27, 0.0 }
 0x4a4   :  { %564 = vadd.xlane.f32.xlu1 %v563_v29  ;;  %v560_v30 = vsel %vm547_vm4, %v2275_v28, 0.0  ;;  %v1002_v29 = vld [vmem:[%s2679_s2] sm:$0xff] }
 0x4a5   :  { %561 = vadd.xlane.f32.xlu0 %v560_v30  ;;  %v1003_v30 = vld [vmem:[%s2679_s2 + $0x8] sm:$0xff] }
 0x531   :  { %v565_v34 = vpop.xlane.xlu1 %564 }
 0x532   :  { %2276 = vrcp.f32 %v565_v34  ;;  %v562_v35 = vpop.xlane.xlu0 %561 }
 0x533   :  { %2278 = vrcp.f32 %v562_v35 }
 0x53c   :  { %v2277_v36 = vpop.eup %2276 }
 0x53d   :  { %v2279_v39 = vpop.eup %2278  ;;  %v569_v41 = vmul.f32 %v2277_v36, %v2273_v27  ;;  %v2220_v27 = vpack.c.bf16 %v1883_v26, %v1882_v25 }
 0x53e   :  { %v568_v40 = vmul.f32 %v2279_v39, %v2275_v28  ;;  %v1004_v28 = vld [vmem:[#allocation2] sm:$0xff] }
 0x53f   :  { %2096 = vmatprep.subr.mxu1 %v1004_v28 }
 0x540   :  { %2060 = vmatprep.mubr.msk.f32.mxu0 %vm547_vm4, %v568_v40 }
 0x541   :  { %2061 = vmatmul.mubr.msk.f32.vlgmr.msra.gmra.mrb[4].mxu0 %vm547_vm4, %v569_v41 }
 0x542   :  { %2203 = vmatpush3.bf16.msra.mxu0 %v2200_v33  ;;  %v1877_v33 = vld [vmem:[#allocation4 + $0x9] ss:$0 sm:$0xff] }
 0x543   :  { %2205 = vmatprep.subr.bf16.mxu0 %v2204_v42 }
 0x546   :  { %2207 = vmatpush3.bf16.msra.mxu0 %v2204_v42 }
 0x547   :  { %2217 = vmatprep.subr.bf16.mxu0 %v2216_v24 }
 0x614   :  { %v2062_v43 = vpop.f32.mrb[4].mxu0 }
 0x615   :  { %v642_v44 = vpop.f32.mrb[5].mxu0 }
 0x616   :  { %2071 = vmatprep.mubr.msk.f32.mxu0 %vm158_vm2, %v642_v44 }
 0x617   :  { %2072 = vmatmul.mubr.msk.f32.vlgmr.msra.gmra.mrb[6].mxu0 %vm158_vm2, %v2062_v43 }
 0x618   :  { %2219 = vmatpush3.bf16.msra.mxu0 %v2216_v24 }
 0x619   :  { %2221 = vmatprep.subr.bf16.mxu0 %v2220_v27 }
 0x61c   :  { %2223 = vmatpush3.bf16.msra.mxu0 %v2220_v27  ;;  %v1896_v27 = vld [vmem:[#allocation4 + $0xf] ss:$0 sm:$0xff] }
 0x6ea   :  { %v2073_v45 = vpop.f32.mrb[6].mxu0 }
 0x6eb   :  { %v738_v47 = vadd.f32 %v2073_v45, %v2463_v13  ;;  %v728_v48 = vpop.f32.mrb[7].mxu0 }
 0x6ec   :  { %v737_v49 = vadd.f32 %v728_v48, %v2461_v12 }
 0x6ed   :  { %v2541_v50 = vadd.f32 %v1870_v46, %v738_v47 }
 0x6ee   :  { %v2543_v51 = vadd.f32 %v1870_v46, %v737_v49  ;;  %v1889_v49 = vld [vmem:[#allocation4 + $0xd] ss:$0 sm:$0xff] }
 0x6ef   :  { %v751_v52 = vsel %vm158_vm2, %v2541_v50, 0.0 }
 0x6f0   :  { %752 = vadd.xlane.f32.xlu1 %v751_v52  ;;  %v748_v53 = vsel %vm158_vm2, %v2543_v51, 0.0 }
 0x6f1   :  { %749 = vadd.xlane.f32.xlu0 %v748_v53 }
 0x77d   :  { %v753_v54 = vpop.xlane.xlu1 %752 }
 0x77e   :  { %v755_v55 = vmul.f32 0.03125, %v753_v54  ;;  %v750_v56 = vpop.xlane.xlu0 %749 }
 0x77f   :  { %v754_v57 = vmul.f32 0.03125, %v750_v56 }
 0x780   :  { %v757_v13 = vsub.f32 %v2541_v50, %v755_v55 }
 0x781   :  { %v756_v12 = vsub.f32 %v2543_v51, %v754_v57 }
 0x782   :  { %v759_v58 = vmul.f32 %v757_v13, %v757_v13 }
 0x783   :  { %v758_v59 = vmul.f32 %v756_v12, %v756_v12 }
 0x784   :  { %v763_v60 = vsel %vm158_vm2, %v759_v58, 0.0  ;;  %v1886_v58 = vld [vmem:[#allocation4 + $0xa] ss:$0 sm:$0xff] }
 0x785   :  { %764 = vadd.xlane.f32.xlu1 %v763_v60  ;;  %v760_v61 = vsel %vm158_vm2, %v758_v59, 0.0 }
 0x786   :  { %761 = vadd.xlane.f32.xlu0 %v760_v61  ;;  %v1887_v61 = vld [vmem:[#allocation4 + $0xb] ss:$0 sm:$0xff] }
 0x7b3   :  { %1104 = vxpose.xlu0.b32.start [1/2] (short) (narrow) %v2588_v31, 16 }
 0x7b7   :  { %1105 = vxpose.xlu0.b32.end [2/2] (short) (narrow) %v2594_v32, 16 }
 0x812   :  { %v765_v4 = vpop.xlane.xlu1 %764 }
 0x813   :  { %v767_v5 = vmul.f32 0.03125, %v765_v4  ;;  %v762_v6 = vpop.xlane.xlu0 %761  ;;  %v2356_v4 = vmov 0  }
 0x814   :  { %v766_v7 = vmul.f32 0.03125, %v762_v6  ;;  %2266 = vset.pattern.permute.xlu1 %v2356_v4  ;;  %2267 = vset.pattern.permute.xlu0 %v2356_v4 }
 0x815   :  { %v769_v8 = vadd.f32 1e-05, %v767_v5 }
 0x816   :  { %v768_v9 = vadd.f32 1e-05, %v766_v7 }
 0x817   :  { %2280 = vrsqrt.f32 %v769_v8 }
 0x818   :  { %2282 = vrsqrt.f32 %v768_v9 }
 0x821   :  { %v2281_v10 = vpop.eup %2280 }
 0x822   :  { %v2283_v14 = vpop.eup %2282  ;;  %v773_v15 = vmul.f32 %v2281_v10, %v757_v13  ;;  %v1302_v10 = vld [vmem:[%s2683_s6] sm:$0xff] }
 0x823   :  { %v772_v16 = vmul.f32 %v2283_v14, %v756_v12 }
 0x824   :  { %v779_v18 = vmul.f32 %v1871_v11, %v773_v15 }
 0x825   :  { %v778_v19 = vmul.f32 %v1871_v11, %v772_v16  ;;  %v1303_v11 = vld [vmem:[%s2683_s6 + $0x8] sm:$0xff] }
 0x826   :  { %v785_v21 = vadd.f32 %v1872_v17, %v779_v18  ;;  %v2232_v14 = vpack.c.bf16 %v1303_v11, %v1302_v10 }
 0x827   :  { %v784_v20 = vadd.f32 %v1872_v17, %v778_v19 }
 0x829   :  { %2082 = vmatprep.mubr.msk.f32.mxu1 %vm158_vm2, %v784_v20  ;;  %v1304_v20 = vld [vmem:[%s2683_s6 + $0x10] sm:$0xff] }
 0x82a   :  { %2083 = vmatmul.mubr.msk.f32.vlgmr.msra.gmra.mrb[6].mxu1 %vm158_vm2, %v785_v21  ;;  %v1305_v21 = vld [vmem:[%s2683_s6 + $0x18] sm:$0xff] }
 0x82b   :  { %2098 = vmatprep.mubr.msk.f32.mxu1 %vm1010_vm5, %v1002_v29  ;;  %2097 = vmatpush3.msra.mxu1 %v1004_v28  ;;  %v2236_v22 = vpack.c.bf16 %v1305_v21, %v1304_v20 }
 0x82e   :  { %2099 = vmatmul.mubr.msk.f32.vlgmr.msra.gmra.mrb[8].mxu1 %vm1010_vm5, %v1003_v30 }
 0x833   :  { %v1120_v52 = vpop.trf.xlu0 }
 0x834   :  { %2105 = vmatprep.mubr.msk.f32.mxu1 %vm547_vm4, %v1120_v52 }
 0x837   :  { %v2602_v57 = vpop.trf.xlu0 }
 0x8fd   :  { %v2084_v34 = vpop.f32.mrb[6].mxu1 }
 0x8fe   :  { %v874_v35 = vadd.f32 %v2084_v34, %v1877_v33  ;;  %v868_v36 = vpop.f32.mrb[7].mxu1 }
 0x8ff   :  { %v869_v37 = vadd.f32 %v1877_v33, %v868_v36 }
 0x900   :  { %v880_v38 = vmul.f32 0.70710677, %v874_v35  ;;  %v878_v45 = vmul.f32 0.5, %v874_v35 }
 0x901   :  { %v879_v39 = vmul.f32 0.70710677, %v869_v37  ;;  %v877_v43 = vmul.f32 0.5, %v869_v37  ;;  %v2100_v48 = vpop.f32.mrb[8].mxu1 }
 0x902   :  { %2284 = verf.f32 %v880_v38  ;;  %v1089_v53 = vadd.f32 %v2100_v48, %v1889_v49  ;;  %v1083_v54 = vpop.f32.mrb[9].mxu1 }
 0x903   :  { %2286 = verf.f32 %v879_v39  ;;  %v1084_v55 = vadd.f32 %v1889_v49, %v1083_v54 }
 0x905   :  { %v2224_v56 = vpack.c.bf16 %v1089_v53, %v1084_v55 }
 0x907   :  { %2225 = vmatprep.subr.bf16.mxu1 %v2224_v56 }
 0x908   :  { %2227 = vmatpush3.bf16.msra.mxu1 %v2224_v56 }
 0x909   :  { %2233 = vmatprep.subr.bf16.mxu1 %v2232_v14 }
 0x90b   :  { %2106 = vmatmul.mubr.msk.f32.vlgmr.msra.gmra.mrb[10].mxu1 %vm547_vm4, %v2602_v57 }
 0x90c   :  { %v2285_v40 = vpop.eup %2284  ;;  %2235 = vmatpush3.bf16.msra.mxu1 %v2232_v14 }
 0x90d   :  { %v2287_v41 = vpop.eup %2286  ;;  %v884_v42 = vadd.f32 1.0, %v2285_v40  ;;  %2237 = vmatprep.subr.bf16.mxu1 %v2236_v22 }
 0x90e   :  { %v883_v44 = vadd.f32 1.0, %v2287_v41 }
 0x90f   :  { %v886_v47 = vmul.f32 %v884_v42, %v878_v45 }
 0x910   :  { %v885_v46 = vmul.f32 %v883_v44, %v877_v43  ;;  %2239 = vmatpush3.bf16.msra.mxu1 %v2236_v22 }
 0x912   :  { %2093 = vmatprep.mubr.msk.f32.mxu0 %vm158_vm2, %v885_v46 }
 0x913   :  { %2094 = vmatmul.mubr.msk.f32.vlgmr.msra.gmra.mrb[8].mxu0 %vm158_vm2, %v886_v47 }
 0x914   :  { %2112 = vmatprep.mubr.msk.f32.mxu0 %vm547_vm4, %v2588_v31 }
 0x9de   :  { %v2107_v5 = vpop.f32.mrb[10].mxu1 }
 0x9df   :  { %v1208_v8 = vpop.f32.mrb[11].mxu1 }
 0x9e6   :  { %v2095_v13 = vpop.f32.mrb[8].mxu0 }
 0x9e7   :  { %v974_v12 = vadd.f32 %v2095_v13, %v2541_v50  ;;  %v964_v59 = vpop.f32.mrb[9].mxu0  ;;  %v1888_v50 = vld [vmem:[#allocation4 + $0xc] ss:$0 sm:$0xff]  ;;  %v1900_v13 = vld [vmem:[#allocation4 + $0x11] ss:$0 sm:$0xff] }
 0x9e8   :  { %v973_v60 = vadd.f32 %v964_v59, %v2543_v51 }
 0x9e9   :  { %v981_v62 = vadd.f32 %v1886_v58, %v974_v12 }
 0x9ea   :  { %v980_v63 = vadd.f32 %v1886_v58, %v973_v60 }
 0x9eb   :  { %v988_v2 = vmul.f32 %v1887_v61, %v981_v62 }
 0x9ec   :  { %v987_v0 = vmul.f32 %v1887_v61, %v980_v63 }
 0x9ed   :  { %v992_v3 = vsel %vm158_vm2, %v988_v2, 0.0 }
 0x9ee   :  { %v989_v1 = vsel %vm158_vm2, %v987_v0, 0.0 }
 0x9ef   :  { %990 = vadd.xlane.f32.xlu1 %v989_v1 }
 0x9f3   :  { %993 = vadd.xlane.f32.xlu1 %v992_v3 }
 0xa7c   :  { %v991_v6 = vpop.xlane.xlu1 %990 }
 0xa7d   :  { %v1000_v7 = vadd.f32 %v1888_v50, %v991_v6 }
 0xa7f   :  { %1096 = vperm.xlu1 %2266, %v1000_v7  }
 0xa80   :  { %v994_v51 = vpop.xlane.xlu1 %993 }
 0xa81   :  { %v1001_v9 = vadd.f32 %v1888_v50, %v994_v51  ;;  %v1905_v51 = vld [vmem:[%s2683_s6 + $0x20] sm:$0xff] }
 0xa83   :  { %1101 = vperm.xlu1 %2266, %v1001_v9   ;;  %v1906_v9 = vld [vmem:[%s2683_s6 + $0x28] sm:$0xff] }
 0xa84   :  { %v2248_v10 = vpack.c.bf16 %v1906_v9, %v1905_v51 }
 0xa86   :  { %2249 = vmatprep.subr.bf16.mxu1 %v2248_v10 }
 0xafe   :  { %v2616_v15 = vpop.permute.xlu1 %1096 }
 0xaff   :  { %v1217_v17 = vmul.f32 %v1208_v8, %v2616_v15 }
 0xb02   :  { %v2618_v16 = vpop.permute.xlu1 %1101 }
 0xb03   :  { %v1218_v18 = vmul.f32 %v2107_v5, %v2618_v16 }
 0xb05   :  { %v2228_v19 = vpack.c.bf16 %v1218_v18, %v1217_v17 }
 0xb07   :  { %2229 = vmatprep.subr.bf16.mxu0 %v2228_v19 }
 0xb08   :  { %2231 = vmatpush3.bf16.msra.mxu0 %v2228_v19  ;;  %v1908_v19 = vld [vmem:[%s2683_s6 + $0x38] sm:$0xff] }
 0xb0b   :  { %2113 = vmatmul.mubr.msk.f32.vlgmr.msra.gmra.mrb[10].mxu0 %vm547_vm4, %v2594_v32 }
 0xb0c   :  { %2130 = vmatprep.mubr.msk.f32.mxu0 %vm547_vm4, %v1120_v52 }
 0xbde   :  { %v2114_v23 = vpop.f32.mrb[10].mxu0 }
 0xbdf   :  { %v1291_v24 = vpop.f32.mrb[11].mxu0  ;;  %v1301_v26 = vadd.f32 %v2114_v23, %v1089_v53 }
 0xbe0   :  { %v1300_v25 = vadd.f32 %v1291_v24, %v1084_v55  ;;  %v1899_v55 = vld [vmem:[#allocation4 + $0x10] ss:$0 sm:$0xff] }
 0xbe2   :  { %2123 = vmatprep.mubr.msk.f32.mxu1 %vm158_vm2, %v1300_v25 }
 0xbe3   :  { %2124 = vmatmul.mubr.msk.f32.vlgmr.msra.gmra.mrb[12].mxu1 %vm158_vm2, %v1301_v26 }
 0xbe4   :  { %2251 = vmatpush3.bf16.msra.mxu1 %v2248_v10 }
 0xcb6   :  { %v2125_v28 = vpop.f32.mrb[12].mxu1 }
 0xcb7   :  { %v1389_v29 = vadd.f32 %v2125_v28, %v1896_v27  ;;  %v1383_v30 = vpop.f32.mrb[13].mxu1 }
 0xcb8   :  { %v1384_v33 = vadd.f32 %v1896_v27, %v1383_v30 }
 0xcb9   :  { %v1397_v34 = vsel %vm158_vm2, %v1389_v29, 0.0 }
 0xcba   :  { %1398 = vadd.xlane.f32.xlu0 %v1397_v34  ;;  %v1394_v35 = vsel %vm158_vm2, %v1384_v33, 0.0 }
 0xcbb   :  { %1395 = vadd.xlane.f32.xlu1 %v1394_v35 }
 0xd47   :  { %v1399_v36 = vpop.xlane.xlu0 %1398 }
 0xd48   :  { %v1401_v37 = vmul.f32 0.03125, %v1399_v36  ;;  %v1396_v38 = vpop.xlane.xlu1 %1395 }
 0xd49   :  { %v1400_v39 = vmul.f32 0.03125, %v1396_v38 }
 0xd4a   :  { %v1403_v40 = vsub.f32 %v1389_v29, %v1401_v37 }
 0xd4b   :  { %v1402_v41 = vsub.f32 %v1384_v33, %v1400_v39 }
 0xd4c   :  { %v1405_v44 = vmul.f32 %v1403_v40, %v1403_v40 }
 0xd4d   :  { %v1404_v42 = vmul.f32 %v1402_v41, %v1402_v41 }
 0xd4e   :  { %v1409_v45 = vsel %vm158_vm2, %v1405_v44, 0.0 }
 0xd4f   :  { %v1406_v43 = vsel %vm158_vm2, %v1404_v42, 0.0  ;;  %v1739_v42 = vld [vmem:[%s2684_s7 + $0x8] sm:$0xff] }
 0xd50   :  { %1407 = vadd.xlane.f32.xlu1 %v1406_v43 }
 0xd54   :  { %1410 = vadd.xlane.f32.xlu1 %v1409_v45 }
 0xddd   :  { %v1408_v46 = vpop.xlane.xlu1 %1407 }
 0xdde   :  { %v1412_v47 = vmul.f32 0.03125, %v1408_v46 }
 0xde0   :  { %v1414_v48 = vadd.f32 1e-05, %v1412_v47 }
 0xde1   :  { %v1411_v49 = vpop.xlane.xlu1 %1410 }
 0xde2   :  { %2288 = vrsqrt.f32 %v1414_v48  ;;  %v1413_v52 = vmul.f32 0.03125, %v1411_v49 }
 0xde4   :  { %v1415_v53 = vadd.f32 1e-05, %v1413_v52 }
 0xde6   :  { %2290 = vrsqrt.f32 %v1415_v53  ;;  %v1912_v53 = vld [vmem:[#allocation4 + $0x13] ss:$0 sm:$0xff] }
 0xdec   :  { %v2289_v54 = vpop.eup %2288 }
 0xded   :  { %v1418_v56 = vmul.f32 %v2289_v54, %v1402_v41  ;;  %v1738_v41 = vld [vmem:[%s2684_s7] sm:$0xff] }
 0xdee   :  { %v2256_v43 = vpack.c.bf16 %v1739_v42, %v1738_v41 }
 0xdef   :  { %v1424_v12 = vmul.f32 %v1899_v55, %v1418_v56 }
 0xdf0   :  { %v2291_v58 = vpop.eup %2290 }
 0xdf1   :  { %v1419_v59 = vmul.f32 %v2291_v58, %v1403_v40  ;;  %v1430_v60 = vadd.f32 %v1900_v13, %v1424_v12 }
 0xdf3   :  { %v1425_v61 = vmul.f32 %v1899_v55, %v1419_v59  ;;  %v1434_v62 = vmul.f32 0.70710677, %v1430_v60  ;;  %v1432_v4 = vmul.f32 0.5, %v1430_v60  ;;  %v1913_v55 = vld [vmem:[#allocation4 + $0x14] ss:$0 sm:$0xff] }
 0xdf5   :  { %v1431_v63 = vadd.f32 %v1900_v13, %v1425_v61  ;;  %2292 = verf.f32 %v1434_v62 }
 0xdf7   :  { %v1435_v0 = vmul.f32 0.70710677, %v1431_v63  ;;  %v1433_v5 = vmul.f32 0.5, %v1431_v63 }
 0xdf9   :  { %2294 = verf.f32 %v1435_v0 }
 0xdff   :  { %v2293_v1 = vpop.eup %2292 }
 0xe00   :  { %v1438_v2 = vadd.f32 1.0, %v2293_v1 }
 0xe02   :  { %v1440_v6 = vmul.f32 %v1438_v2, %v1432_v4 }
 0xe03   :  { %v2295_v3 = vpop.eup %2294 }
 0xe04   :  { %v1439_v50 = vadd.f32 1.0, %v2295_v3 }
 0xe06   :  { %v1441_v7 = vmul.f32 %v1439_v50, %v1433_v5 }
 0xe08   :  { %v2240_v8 = vpack.c.bf16 %v1441_v7, %v1440_v6 }
 0xe0a   :  { %2241 = vmatprep.subr.bf16.mxu0 %v2240_v8 }
 0xe0b   :  { %2243 = vmatpush3.bf16.msra.mxu0 %v2240_v8 }
 0xe0e   :  { %2131 = vmatmul.mubr.msk.f32.vlgmr.msra.gmra.mrb[12].mxu0 %vm547_vm4, %v2602_v57 }
 0xe0f   :  { %2137 = vmatprep.mubr.msk.f32.mxu0 %vm547_vm4, %v2588_v31  ;;  %v1907_v31 = vld [vmem:[%s2683_s6 + $0x30] sm:$0xff] }
 0xe10   :  { %v2252_v20 = vpack.c.bf16 %v1908_v19, %v1907_v31 }
 0xe12   :  { %2253 = vmatprep.subr.bf16.mxu1 %v2252_v20 }
 0xe13   :  { %2255 = vmatpush3.bf16.msra.mxu1 %v2252_v20 }
 0xee1   :  { %v2132_v11 = vpop.f32.mrb[12].mxu0 }
 0xee2   :  { %v1518_v14 = vmul.f32 %v2132_v11, %v2618_v16  ;;  %v1508_v17 = vpop.f32.mrb[13].mxu0 }
 0xee3   :  { %v1517_v57 = vmul.f32 %v1508_v17, %v2616_v15 }
 0xee5   :  { %v2244_v18 = vpack.c.bf16 %v1518_v14, %v1517_v57 }
 0xee7   :  { %2245 = vmatprep.subr.bf16.mxu0 %v2244_v18 }
 0xee8   :  { %2247 = vmatpush3.bf16.msra.mxu0 %v2244_v18 }
 0xee9   :  { %2257 = vmatprep.subr.bf16.mxu0 %v2256_v43 }
 0xeeb   :  { %2138 = vmatmul.mubr.msk.f32.vlgmr.msra.gmra.mrb[14].mxu0 %vm547_vm4, %v2594_v32  ;;  %v1909_v32 = vld [vmem:[#allocation4 + $0x12] ss:$0 sm:$0xff] }
 0xeec   :  { %2259 = vmatpush3.bf16.msra.mxu0 %v2256_v43 }
 0xfbe   :  { %v2139_v16 = vpop.f32.mrb[14].mxu0 }
 0xfbf   :  { %v1585_v21 = vpop.f32.mrb[15].mxu0  ;;  %v1595_v22 = vadd.f32 %v2139_v16, %v1441_v7 }
 0xfc0   :  { %v1594_v15 = vadd.f32 %v1585_v21, %v1440_v6  ;;  %v1914_v6 = vld [vmem:[#allocation4 + $0xe] ss:$0 sm:$0xff] }
 0xfc2   :  { %2148 = vmatprep.mubr.msk.f32.mxu1 %vm158_vm2, %v1594_v15 }
 0xfc3   :  { %2149 = vmatmul.mubr.msk.f32.vlgmr.msra.gmra.mrb[14].mxu1 %vm158_vm2, %v1595_v22 }
0x1096   :  { %v2150_v23 = vpop.f32.mrb[14].mxu1 }
0x1097   :  { %v1678_v24 = vpop.f32.mrb[15].mxu1  ;;  %v1684_v26 = vadd.f32 %v2150_v23, %v1909_v32 }
0x1098   :  { %v1679_v25 = vadd.f32 %v1909_v32, %v1678_v24 }
0x1099   :  { %v1692_v28 = vsel %vm547_vm4, %v1684_v26, 0.0 }
0x109a   :  { %v1689_v27 = vsel %vm547_vm4, %v1679_v25, 0.0 }
0x109b   :  { %1690 = vadd.xlane.f32.xlu1 %v1689_v27 }
0x109f   :  { %1693 = vadd.xlane.f32.xlu1 %v1692_v28 }
0x1128   :  { %v1691_v29 = vpop.xlane.xlu1 %1690 }
0x1129   :  { %v1696_v30 = vmul.f32 0.0625, %v1691_v29 }
0x112b   :  { %v1698_v33 = vsub.f32 %v1679_v25, %v1696_v30 }
0x112c   :  { %v1694_v34 = vpop.xlane.xlu1 %1693 }
0x112d   :  { %v1697_v35 = vmul.f32 0.0625, %v1694_v34  ;;  %v1700_v36 = vmul.f32 %v1698_v33, %v1698_v33 }
0x112f   :  { %v1699_v37 = vsub.f32 %v1684_v26, %v1697_v35  ;;  %v1702_v38 = vsel %vm547_vm4, %v1700_v36, 0.0 }
0x1130   :  { %1703 = vadd.xlane.f32.xlu1 %v1702_v38 }
0x1131   :  { %v1701_v39 = vmul.f32 %v1699_v37, %v1699_v37 }
0x1133   :  { %v1705_v40 = vsel %vm547_vm4, %v1701_v39, 0.0 }
0x1134   :  { %1706 = vadd.xlane.f32.xlu1 %v1705_v40 }
0x11bd   :  { %v1704_v44 = vpop.xlane.xlu1 %1703 }
0x11be   :  { %v1708_v45 = vmul.f32 0.0625, %v1704_v44 }
0x11c0   :  { %v1710_v46 = vadd.f32 1e-05, %v1708_v45 }
0x11c1   :  { %v1707_v47 = vpop.xlane.xlu1 %1706 }
0x11c2   :  { %2296 = vrsqrt.f32 %v1710_v46  ;;  %v1709_v48 = vmul.f32 0.0625, %v1707_v47 }
0x11c4   :  { %v1711_v49 = vadd.f32 1e-05, %v1709_v48 }
0x11c6   :  { %2298 = vrsqrt.f32 %v1711_v49 }
0x11cc   :  { %v2297_v52 = vpop.eup %2296 }
0x11cd   :  { %v1714_v54 = vmul.f32 %v2297_v52, %v1698_v33 }
0x11cf   :  { %v1720_v56 = vmul.f32 %v1912_v53, %v1714_v54 }
0x11d0   :  { %v2299_v13 = vpop.eup %2298 }
0x11d1   :  { %v1715_v12 = vmul.f32 %v2299_v13, %v1699_v37  ;;  %v1726_v58 = vadd.f32 %v1913_v55, %v1720_v56 }
0x11d3   :  { %v1721_v59 = vmul.f32 %v1912_v53, %v1715_v12  ;;  %v1730_v60 = vmul.f32 0.70710677, %v1726_v58  ;;  %v1728_v0 = vmul.f32 0.5, %v1726_v58 }
0x11d5   :  { %v1727_v61 = vadd.f32 %v1913_v55, %v1721_v59  ;;  %2300 = verf.f32 %v1730_v60 }
0x11d7   :  { %v1731_v62 = vmul.f32 0.70710677, %v1727_v61  ;;  %v1729_v4 = vmul.f32 0.5, %v1727_v61 }
0x11d9   :  { %2302 = verf.f32 %v1731_v62 }
0x11df   :  { %v2301_v63 = vpop.eup %2300 }
0x11e0   :  { %v1734_v1 = vadd.f32 1.0, %v2301_v63 }
0x11e2   :  { %v1736_v2 = vmul.f32 %v1734_v1, %v1728_v0 }
0x11e3   :  { %v2303_v3 = vpop.eup %2302 }
0x11e4   :  { %2155 = vmatprep.mubr.msk.f32.mxu0 %vm547_vm4, %v1736_v2  ;;  %v1735_v5 = vadd.f32 1.0, %v2303_v3 }
0x11e6   :  { %v1737_v50 = vmul.f32 %v1735_v5, %v1729_v4 }
0x11e8   :  { %2156 = vmatmul.mubr.msk.f32.vlgmr.msra.gmra.mrb[16].mxu0 %vm547_vm4, %v1737_v50 }
0x12bb   :  { %v2157_v7 = vpop.f32.mrb[16].mxu0 }
0x12bc   :  { %v1823_v8 = vadd.f32 %v2157_v7, %v1914_v6  ;;  %v1817_v51 = vpop.f32.mrb[17].mxu0 }
0x12bd   :  { %v1818_v9 = vadd.f32 %v1914_v6, %v1817_v51 }
0x12be   :  { %1828 = vst.msk [vmem:[%s2686_s9 + $0x8] sm:$0xff] %vm1826_vm6, %v1823_v8 }
0x12bf   :  { %1827 = vst.msk [vmem:[%s2686_s9] sm:$0xff] %vm1826_vm6, %v1818_v9 }
0x12c0   :  { %1833 = vsyncpa [#allocation3], 1 }
0x12c1   :  { %1834 = vsyncpa [#allocation5], 1 }

</bundles_post_ra>
